<compile_context>
chip_gen: v7x
topology: tpu7x:2x2x1
jax: 0.10.0
libtpu: 0.0.40
codegen_flags: <defaults>
</compile_context>

<pallas_src>
import functools

import jax
import jax.numpy as jnp
from jax import lax
from jax.experimental import pallas as pl
from jax.experimental.pallas import tpu as pltpu


# ----------------------------- sizing helpers --------------------------------

def _vmem_limit_bytes():
    """Generation-aware scoped-VMEM limit: ~75% of physical, capped at 100 MiB.

    v7x (64 MiB physical)  -> 48 MiB budget (headroom for Mosaic scratch).
    v5e/v6e (128 MiB)      -> 96 MiB budget.
    """
    try:
        phys = int(pltpu.get_tpu_info().vmem_capacity_bytes)
    except Exception:
        phys = 128 * 1024 * 1024
    return min((phys * 3) // 4, 100 * 1024 * 1024)


def _pick_tile(dim, cap):
    """Largest tile <= cap that divides dim, from an (8,128)-friendly ladder."""
    for t in (2048, 1024, 512, 256, 128, 64, 32, 16, 8):
        if t <= cap and dim % t == 0:
            return t
    return dim  # full dim is always a legal block


def _layernorm(z, g, b, eps=1e-5):
    # PyTorch LayerNorm: biased variance, eps=1e-5.  rsqrt goes to the EUP.
    mu = jnp.mean(z, axis=-1, keepdims=True)
    zc = z - mu
    var = jnp.mean(zc * zc, axis=-1, keepdims=True)
    return zc * lax.rsqrt(var + eps) * g + b


# --------------------------- K1: fused QKV projection ------------------------

def _qkv_proj_kernel(x_ref, w_ref, b_ref, q_ref, k_ref, v_ref):
    # x_ref: (tm, E) f32; w_ref: (E, 3E) bf16 (q columns pre-scaled);
    # b_ref: (1, 3E) f32; outputs: three (tm, E) bf16 tiles.
    e = x_ref.shape[-1]
    x = x_ref[...].astype(w_ref.dtype)
    y = jnp.dot(x, w_ref[...], preferred_element_type=jnp.float32) + b_ref[...]
    q_ref[...] = y[:, :e].astype(q_ref.dtype)
    k_ref[...] = y[:, e:2 * e].astype(k_ref.dtype)
    v_ref[...] = y[:, 2 * e:].astype(v_ref.dtype)


def qkv_proj(x2d, wqkv_t, bqkv, *, tm, vmem_limit, out_dtype):
    M, E = x2d.shape
    E3 = wqkv_t.shape[1]
    out_spec = pl.BlockSpec((tm, E), lambda i: (i, 0))
    return pl.pallas_call(
        _qkv_proj_kernel,
        out_shape=tuple(jax.ShapeDtypeStruct((M, E), out_dtype) for _ in range(3)),
        grid=(M // tm,),
        in_specs=[
            pl.BlockSpec((tm, E), lambda i: (i, 0)),
            pl.BlockSpec((E, E3), lambda i: (0, 0)),
            pl.BlockSpec((1, E3), lambda i: (0, 0)),
        ],
        out_specs=(out_spec, out_spec, out_spec),
        compiler_params=pltpu.CompilerParams(
            dimension_semantics=("parallel",),
            vmem_limit_bytes=vmem_limit),
    )(x2d, wqkv_t, bqkv)


# -------------- K2: flash attention + fused output projection ----------------

def _flash_attn_kernel(q_ref, k_ref, v_ref, wo_ref, bo_ref, o_ref,
                       m_scr, l_scr, acc_scr, *, nhead):
    # q_ref: (tq, E) bf16 (already scaled); k_ref/v_ref: (tk, E) bf16.
    # wo_ref: (E, E) bf16 pre-transposed; bo_ref: (1, E) f32; o_ref: (tq, E) f32.
    # Scratch: m_scr/l_scr (nhead, tq, 1) f32; acc_scr (tq, E) f32 (head concat).
    ki = pl.program_id(2)
    n_kv = pl.num_programs(2)
    e = q_ref.shape[-1]
    dh = e // nhead

    @pl.when(ki == 0)
    def _():
        m_scr[...] = jnp.full(m_scr.shape, -jnp.inf, dtype=jnp.float32)
        l_scr[...] = jnp.zeros_like(l_scr)
        acc_scr[...] = jnp.zeros_like(acc_scr)

    q = q_ref[...]
    k = k_ref[...]
    v = v_ref[...]

    for h in range(nhead):
        sl = slice(h * dh, (h + 1) * dh)
        # q_h @ k_h^T without materializing a transpose: contract head dims.
        s = lax.dot_general(q[:, sl], k[:, sl], (((1,), (1,)), ((), ())),
                            preferred_element_type=jnp.float32)   # (tq, tk)
        m_prev = m_scr[h]                                          # (tq, 1)
        m_new = jnp.maximum(m_prev, jnp.max(s, axis=-1, keepdims=True))
        alpha = jnp.exp(m_prev - m_new)                            # (tq, 1)
        p = jnp.exp(s - m_new)                                     # (tq, tk) f32
        l_scr[h] = alpha * l_scr[h] + jnp.sum(p, axis=-1, keepdims=True)
        acc_scr[:, sl] = alpha * acc_scr[:, sl] + jnp.dot(
            p.astype(v.dtype), v[:, sl], preferred_element_type=jnp.float32)
        m_scr[h] = m_new

    @pl.when(ki == n_kv - 1)
    def _():
        # Exact per-head normalization (once per row; accuracy over approx).
        for h in range(nhead):
            sl = slice(h * dh, (h + 1) * dh)
            acc_scr[:, sl] = acc_scr[:, sl] * (1.0 / l_scr[h])
        # Single full-depth out-projection over the concatenated heads.
        attn = acc_scr[...].astype(wo_ref.dtype)
        out = jnp.dot(attn, wo_ref[...],
                      preferred_element_type=jnp.float32) + bo_ref[...]
        o_ref[...] = out.astype(o_ref.dtype)


def flash_attn(q, k, v, wout_t, bout, *, nhead, tq, tk, vmem_limit):
    B, L, E = q.shape
    return pl.pallas_call(
        functools.partial(_flash_attn_kernel, nhead=nhead),
        out_shape=jax.ShapeDtypeStruct((B, L, E), jnp.float32),
        grid=(B, L // tq, L // tk),
        in_specs=[
            pl.BlockSpec((None, tq, E), lambda b, qi, ki: (b, qi, 0)),
            pl.BlockSpec((None, tk, E), lambda b, qi, ki: (b, ki, 0)),
            pl.BlockSpec((None, tk, E), lambda b, qi, ki: (b, ki, 0)),
            pl.BlockSpec((E, E), lambda b, qi, ki: (0, 0)),
            pl.BlockSpec((1, E), lambda b, qi, ki: (0, 0)),
        ],
        out_specs=pl.BlockSpec((None, tq, E), lambda b, qi, ki: (b, qi, 0)),
        scratch_shapes=[
            pltpu.VMEM((nhead, tq, 1), jnp.float32),   # running max m
            pltpu.VMEM((nhead, tq, 1), jnp.float32),   # running sum l
            pltpu.VMEM((tq, E), jnp.float32),          # head-concat accumulator
        ],
        compiler_params=pltpu.CompilerParams(
            dimension_semantics=("parallel", "parallel", "arbitrary"),
            vmem_limit_bytes=vmem_limit),
    )(q, k, v, wout_t, bout)


# ------- K3: residual + LN1 + FFN (FF-chunked) + residual + LN2 (fused) ------

def _resid_ffn_kernel(x_ref, attn_ref, w1_ref, b1_ref, w2_ref, b2_ref,
                      g1_ref, be1_ref, g2_ref, be2_ref, o_ref,
                      h_scr, acc_scr):
    j = pl.program_id(1)

    @pl.when(j == 0)
    def _():
        h_scr[...] = _layernorm(x_ref[...] + attn_ref[...],
                                g1_ref[...], be1_ref[...])          # norm1
        acc_scr[...] = jnp.zeros_like(acc_scr)

    hb = h_scr[...].astype(w1_ref.dtype)                            # bf16
    ff = jnp.dot(hb, w1_ref[...],
                 preferred_element_type=jnp.float32) + b1_ref[...]  # (tm, tf)
    ff = jnp.maximum(ff, 0.0).astype(w2_ref.dtype)                  # relu, bf16
    acc_scr[...] += jnp.dot(ff, w2_ref[...],
                            preferred_element_type=jnp.float32)     # (tm, E)

    @pl.when(j == pl.num_programs(1) - 1)
    def _():
        out = _layernorm(h_scr[...] + acc_scr[...] + b2_ref[...],
                         g2_ref[...], be2_ref[...])                 # norm2
        o_ref[...] = out.astype(o_ref.dtype)


def resid_ffn(x2d, attn2d, w1_t, b1, w2_t, b2, g1, be1, g2, be2,
              *, tm, tf, vmem_limit):
    M, E = x2d.shape
    FF = w1_t.shape[1]
    vec = lambda: pl.BlockSpec((1, E), lambda i, j: (0, 0))
    return pl.pallas_call(
        _resid_ffn_kernel,
        out_shape=jax.ShapeDtypeStruct((M, E), jnp.float32),
        grid=(M // tm, FF // tf),
        in_specs=[
            pl.BlockSpec((tm, E), lambda i, j: (i, 0)),    # x (residual)
            pl.BlockSpec((tm, E), lambda i, j: (i, 0)),    # attn
            pl.BlockSpec((E, tf), lambda i, j: (0, j)),    # w1_t chunk
            pl.BlockSpec((1, tf), lambda i, j: (0, j)),    # b1 chunk
            pl.BlockSpec((tf, E), lambda i, j: (j, 0)),    # w2_t chunk
            vec(), vec(), vec(), vec(), vec(),             # b2, ln1 g/b, ln2 g/b
        ],
        out_specs=pl.BlockSpec((tm, E), lambda i, j: (i, 0)),
        scratch_shapes=[pltpu.VMEM((tm, E), jnp.float32),   # h = LN1(x+attn)
                        pltpu.VMEM((tm, E), jnp.float32)],  # FFN accumulator
        compiler_params=pltpu.CompilerParams(
            dimension_semantics=("parallel", "arbitrary"),
            vmem_limit_bytes=vmem_limit),
    )(x2d, attn2d, w1_t, b1, w2_t, b2, g1, be1, g2, be2)


# --------------------------- layer forward ----------------------------------

def prepare_params(p, compute_dtype=jnp.bfloat16):
    """One-time packing: transpose to (in,out), fold query scale, cast to bf16."""
    E = p["out_w"].shape[0]
    H = p["nhead"]
    dh = E // H
    scale = dh ** (-0.5)

    wqkv_t = p["in_proj_w"][:3 * E].T                     # (E, 3E)
    bqkv = p["in_proj_b"][:3 * E]
    # PyTorch does q = (W_q x + b_q) * scale; fold scale into W_q/b_q columns.
    scale_vec = jnp.concatenate(
        [jnp.full((E,), scale, jnp.float32), jnp.ones((2 * E,), jnp.float32)])
    wqkv_t = wqkv_t * scale_vec[None, :]
    bqkv = (bqkv * scale_vec).reshape(1, 3 * E)

    FF = p["w1"].shape[0]
    return {
        "nhead": H,
        "wqkv_t": wqkv_t.astype(compute_dtype),
        "bqkv": bqkv.astype(jnp.float32),
        "wout_t": p["out_w"].T.astype(compute_dtype),
        "bout": p["out_b"].reshape(1, E).astype(jnp.float32),
        "w1_t": p["w1"].T.astype(compute_dtype),
        "b1": p["b1"].reshape(1, FF).astype(jnp.float32),
        "w2_t": p["w2"].T.astype(compute_dtype),
        "b2": p["b2"].reshape(1, E).astype(jnp.float32),
        "ln1_g": p["ln1_g"].reshape(1, E), "ln1_b": p["ln1_b"].reshape(1, E),
        "ln2_g": p["ln2_g"].reshape(1, E), "ln2_b": p["ln2_b"].reshape(1, E),
    }


def encoder_layer(src, prep):
    """forward_post with pos=None, dropout=identity (eval)."""
    L, B, E = src.shape
    H = prep["nhead"]
    FF = prep["w1_t"].shape[1]
    M = B * L

    vmem_limit = _vmem_limit_bytes()
    tm = _pick_tile(M, 512)    # row tile for K1/K3 (~85% HBM roofline at 512)
    tq = _pick_tile(L, 256)    # flash query tile
    tk = _pick_tile(L, 512)    # flash key/value tile
    tf = _pick_tile(FF, 1024)  # FF chunk (bounds resident FFN weight slices)

    # Single HBM transpose to batch-major, then dense 2D (rows, E) everywhere.
    x2d = jnp.transpose(src, (1, 0, 2)).reshape(M, E)

    q, k, v = qkv_proj(x2d, prep["wqkv_t"], prep["bqkv"], tm=tm,
                       vmem_limit=vmem_limit, out_dtype=prep["wqkv_t"].dtype)
    attn = flash_attn(q.reshape(B, L, E), k.reshape(B, L, E), v.reshape(B, L, E),
                      prep["wout_t"], prep["bout"], nhead=H,
                      tq=tq, tk=tk, vmem_limit=vmem_limit)        # (B, L, E) f32
    out2d = resid_ffn(x2d, attn.reshape(M, E),
                      prep["w1_t"], prep["b1"], prep["w2_t"], prep["b2"],
                      prep["ln1_g"], prep["ln1_b"], prep["ln2_g"], prep["ln2_b"],
                      tm=tm, tf=tf, vmem_limit=vmem_limit)        # (M, E) f32
    return jnp.transpose(out2d.reshape(B, L, E), (1, 0, 2))       # (L, B, E)


# --------------------------- pure-JAX reference ------------------------------

def encoder_layer_ref(src, p):
    L, B, E = src.shape
    H = p["nhead"]
    Dh = E // H
    x = src.reshape(L * B, E)

    def lin(z, w, b):
        return z @ w.T + b

    def ln(z, g, b):
        mu = z.mean(-1, keepdims=True)
        var = ((z - mu) ** 2).mean(-1, keepdims=True)
        return (z - mu) / jnp.sqrt(var + 1e-5) * g + b

    q = lin(x, p["in_proj_w"][:E], p["in_proj_b"][:E])
    k = lin(x, p["in_proj_w"][E:2 * E], p["in_proj_b"][E:2 * E])
    v = lin(x, p["in_proj_w"][2 * E:3 * E], p["in_proj_b"][2 * E:3 * E])
    scale = Dh ** (-0.5)
    qh = jnp.transpose((q * scale).reshape(L, B * H, Dh), (1, 0, 2))
    kh = jnp.transpose(k.reshape(L, B * H, Dh), (1, 0, 2))
    vh = jnp.transpose(v.reshape(L, B * H, Dh), (1, 0, 2))
    s = jnp.einsum("bld,bmd->blm", qh, kh)
    w = jax.nn.softmax(s, axis=-1)
    a = jnp.einsum("blm,bmd->bld", w, vh)
    attn = jnp.transpose(a, (1, 0, 2)).reshape(L * B, E)
    attn = lin(attn, p["out_w"], p["out_b"])
    h = ln(x + attn, p["ln1_g"], p["ln1_b"])
    ff = lin(jnp.maximum(lin(h, p["w1"], p["b1"]), 0.0), p["w2"], p["b2"])
    out = ln(h + ff, p["ln2_g"], p["ln2_b"])
    return out.reshape(L, B, E)


# --------------------------- parameter init ----------------------------------

def init_params(key, d_model, nhead, dim_feedforward):
    E, FF = d_model, dim_feedforward
    ks = jax.random.split(key, 6)

    def xavier(k, shape):
        fan_out, fan_in = shape
        bound = (6.0 / (fan_in + fan_out)) ** 0.5
        return jax.random.uniform(k, shape, jnp.float32, -bound, bound)

    def linear_init(kw, kb, out_f, in_f):
        bound = 1.0 / (in_f ** 0.5)
        w = jax.random.uniform(kw, (out_f, in_f), jnp.float32, -bound, bound)
        b = jax.random.uniform(kb, (out_f,), jnp.float32, -bound, bound)
        return w, b

    w1, b1 = linear_init(ks[2], ks[3], FF, E)
    w2, b2 = linear_init(ks[4], ks[5], E, FF)

    return {
        "nhead": nhead,
        # GlobalMultiheadAttention (9E x E weight; only first 3E rows used).
        "in_proj_w": xavier(ks[0], (9 * E, E)),
        "in_proj_b": jnp.zeros((9 * E,), jnp.float32),
        "out_w": xavier(ks[1], (E, E)),
        "out_b": jnp.zeros((E,), jnp.float32),
        # feed-forward
        "w1": w1, "b1": b1, "w2": w2, "b2": b2,
        # layer norms
        "ln1_g": jnp.ones((E,), jnp.float32),
        "ln1_b": jnp.zeros((E,), jnp.float32),
        "ln2_g": jnp.ones((E,), jnp.float32),
        "ln2_b": jnp.zeros((E,), jnp.float32),
    }


# --------------------------- main --------------------------------------------

if __name__ == "__main__":
    L, B, E, H, FF = 8, 2, 32, 4, 64   # seq, batch, d_model, nhead, dim_feedforward

    key = jax.random.PRNGKey(0)
    k_param, k_src = jax.random.split(key)
    params = init_params(k_param, E, H, FF)
    prep = prepare_params(params)
    src = jax.random.normal(k_src, (L, B, E), jnp.float32)

    out = jax.block_until_ready(encoder_layer(src, prep))
    ref = encoder_layer_ref(src, params)

    assert out.shape == (L, B, E)
    max_err = float(jnp.max(jnp.abs(out - ref)))
    # Tolerance covers the bf16 operand rounding of every matmul (weights and
    # activations are bf16, accumulation f32); with f32 weights/operands the
    # kernel matches the reference to ~1e-5.
    assert max_err < 5e-2, f"mismatch vs reference: {max_err}"

    print("KERNEL_OK")
</pallas_src>

<mosaic_0001>
module attributes {stable_mosaic.version = 11 : i64} {
  func.func @_qkv_proj_kernel(%arg0: i32, %arg1: memref<16x32xf32, #tpu.memory_space<vmem>>, %arg2: memref<32x96xbf16, #tpu.memory_space<vmem>>, %arg3: memref<1x96xf32, #tpu.memory_space<vmem>>, %arg4: memref<16x32xbf16, #tpu.memory_space<vmem>>, %arg5: memref<16x32xbf16, #tpu.memory_space<vmem>>, %arg6: memref<16x32xbf16, #tpu.memory_space<vmem>>) attributes {dimension_semantics = [#tpu.dimension_semantics<parallel>], iteration_bounds = array<i64: 1>, scalar_prefetch = 0 : i64, scratch_operands = 0 : i64, tpu.core_type = #tpu.core_type<tc>, window_params = [{transform_indices = @transform_0, window_bounds = array<i64: 16, 32>}, {pipeline_mode = #tpu.pipeline_mode<synchronous>, transform_indices = @transform_1, window_bounds = array<i64: 32, 96>}, {pipeline_mode = #tpu.pipeline_mode<synchronous>, transform_indices = @transform_2, window_bounds = array<i64: 1, 96>}, {transform_indices = @transform_3, window_bounds = array<i64: 16, 32>}, {transform_indices = @transform_4, window_bounds = array<i64: 16, 32>}, {transform_indices = @transform_5, window_bounds = array<i64: 16, 32>}]} {
    %c0 = arith.constant 0 : index
    %c0_0 = arith.constant 0 : index
    %0 = vector.load %arg1[%c0, %c0_0] : memref<16x32xf32, #tpu.memory_space<vmem>>, vector<16x32xf32>
    %1 = arith.truncf %0 : vector<16x32xf32> to vector<16x32xbf16>
    %c0_1 = arith.constant 0 : index
    %c0_2 = arith.constant 0 : index
    %2 = vector.load %arg2[%c0_1, %c0_2] : memref<32x96xbf16, #tpu.memory_space<vmem>>, vector<32x96xbf16>
    %cst = arith.constant dense<0.000000e+00> : vector<16x96xf32>
    %3 = tpu.matmul %1, %2, %cst {dimension_numbers = #tpu.dot_dimension_numbers<[1], [0], [0], [1], [0, 0, 1, 1], [], []>} : vector<16x32xbf16>, vector<32x96xbf16>, vector<16x96xf32> -> vector<16x96xf32>
    %c0_3 = arith.constant 0 : index
    %c0_4 = arith.constant 0 : index
    %4 = vector.load %arg3[%c0_3, %c0_4] : memref<1x96xf32, #tpu.memory_space<vmem>>, vector<1x96xf32>
    %5 = vector.broadcast %4 : vector<1x96xf32> to vector<16x96xf32>
    %6 = arith.addf %3, %5 : vector<16x96xf32>
    %7 = vector.extract_strided_slice %6 {offsets = [0, 0], sizes = [16, 32], strides = [1, 1]} : vector<16x96xf32> to vector<16x32xf32>
    %8 = arith.truncf %7 : vector<16x32xf32> to vector<16x32xbf16>
    %c0_5 = arith.constant 0 : index
    %c0_6 = arith.constant 0 : index
    %9 = vector.load %arg4[%c0_5, %c0_6] : memref<16x32xbf16, #tpu.memory_space<vmem>>, vector<16x32xbf16>
    tpu.vector_store %arg4[%c0_5, %c0_6], %8 {strides = array<i32>} : memref<16x32xbf16, #tpu.memory_space<vmem>>, vector<16x32xbf16>,
    %10 = vector.extract_strided_slice %6 {offsets = [0, 32], sizes = [16, 32], strides = [1, 1]} : vector<16x96xf32> to vector<16x32xf32>
    %11 = arith.truncf %10 : vector<16x32xf32> to vector<16x32xbf16>
    %c0_7 = arith.constant 0 : index
    %c0_8 = arith.constant 0 : index
    %12 = vector.load %arg5[%c0_7, %c0_8] : memref<16x32xbf16, #tpu.memory_space<vmem>>, vector<16x32xbf16>
    tpu.vector_store %arg5[%c0_7, %c0_8], %11 {strides = array<i32>} : memref<16x32xbf16, #tpu.memory_space<vmem>>, vector<16x32xbf16>,
    %13 = vector.extract_strided_slice %6 {offsets = [0, 64], sizes = [16, 32], strides = [1, 1]} : vector<16x96xf32> to vector<16x32xf32>
    %14 = arith.truncf %13 : vector<16x32xf32> to vector<16x32xbf16>
    %c0_9 = arith.constant 0 : index
    %c0_10 = arith.constant 0 : index
    %15 = vector.load %arg6[%c0_9, %c0_10] : memref<16x32xbf16, #tpu.memory_space<vmem>>, vector<16x32xbf16>
    tpu.vector_store %arg6[%c0_9, %c0_10], %14 {strides = array<i32>} : memref<16x32xbf16, #tpu.memory_space<vmem>>, vector<16x32xbf16>,
    return
  }
  func.func @transform_0(%arg0: i32) -> (i32, i32) {
    %c0_i32 = arith.constant 0 : i32
    %c0_i32_0 = arith.constant 0 : i32
    return %arg0, %c0_i32 : i32, i32
  }
  func.func @transform_1(%arg0: i32) -> (i32, i32) {
    %c0_i32 = arith.constant 0 : i32
    %c0_i32_0 = arith.constant 0 : i32
    %c0_i32_1 = arith.constant 0 : i32
    return %c0_i32, %c0_i32_0 : i32, i32
  }
  func.func @transform_2(%arg0: i32) -> (i32, i32) {
    %c0_i32 = arith.constant 0 : i32
    %c0_i32_0 = arith.constant 0 : i32
    %c0_i32_1 = arith.constant 0 : i32
    return %c0_i32, %c0_i32_0 : i32, i32
  }
  func.func @transform_3(%arg0: i32) -> (i32, i32) {
    %c0_i32 = arith.constant 0 : i32
    %c0_i32_0 = arith.constant 0 : i32
    return %arg0, %c0_i32 : i32, i32
  }
  func.func @transform_4(%arg0: i32) -> (i32, i32) {
    %c0_i32 = arith.constant 0 : i32
    %c0_i32_0 = arith.constant 0 : i32
    return %arg0, %c0_i32 : i32, i32
  }
  func.func @transform_5(%arg0: i32) -> (i32, i32) {
    %c0_i32 = arith.constant 0 : i32
    %c0_i32_0 = arith.constant 0 : i32
    return %arg0, %c0_i32 : i32, i32
  }
}

</mosaic_0001>

<bundles_post_ra>
// kernel: tpu_custom_call.1
= control target key start
LH: loop header
LB: loop body
LE: loop exit
PB: predicated region body
PF: predicated region fallthrough
CT: control target
= control target key end

     0   :  { %11 = vsyncpa [#allocation3], 0  ;;  %s522_s0 = inlined_call_operand.hbm [shape: f32[16,32], index: 0, kind: input, shape index: {}]   ;;  %s523_s1 = inlined_call_operand.hbm [shape: bf16[32,96], index: 1, kind: input, shape index: {}]   ;;  %s524_s2 = inlined_call_operand.hbm [shape: f32[1,96], index: 2, kind: input, shape index: {}]   ;;  %s525_s3 = inlined_call_operand.hbm [shape: bf16[16,32], index: 3, kind: output, shape index: {0}]   ;;  %s526_s4 = inlined_call_operand.hbm [shape: bf16[16,32], index: 4, kind: output, shape index: {1}]   ;;  %s527_s5 = inlined_call_operand.hbm [shape: bf16[16,32], index: 5, kind: output, shape index: {2}]  }
   0x1   :  { %12 = vsyncpa [#allocation6], 0 }
   0x2   :  { %13 = vsyncpa [#allocation4], 0 }
   0x3   :  { %14 = vsyncpa [#allocation10], 0  ;;  %s380_s18 = smov [#allocation5]   ;;  %s240_s22 = scalar_lea.hbm %s523_s1, 256 }
   0x4   :  { %s32_s19 = sshll.u32 %s380_s18, 4  ;;  %p241_p0 = scmp.ne.s32.totalorder %s523_s1, %s240_s22  ;;  %s33_s19 = int_to_ptr.vmem [resolvable:$true] %s32_s19 }
   0x5   :  { %p244_p1 = scmp.lt.u32.totalorder %s240_s22, %s523_s1 }
   0x7   :  { %p246_p2 = pnand %p244_p1, %p241_p0 }
   0x9   :  { %249 = shalt.err (!%p246_p2)
}
   0xa   :  { %s250_s27 = scalar_lea.vmem %s33_s19, 256  ;;  %p255_p4 = scmp.lt.s32.totalorder %s33_s19, %s33_s19 }
   0xb   :  { %p251_p3 = scmp.ne.s32.totalorder %s33_s19, %s250_s27  ;;  %p256_p5 = scmp.lt.s32.totalorder %s250_s27, %s250_s27 }
   0xd   :  { %p257_p6 = por %p256_p5, %p255_p4 }
   0xf   :  { %p258_p7 = pnand %p257_p6, %p251_p3 }
  0x11   :  { %261 = shalt.err (!%p258_p7)
}
  0x12   :  { %s381_s28 = smov 64   ;;  %s382_s29 = smov 4  }
  0x13   :  { %38 = dma.hbm_to_vmem [thread:$0]  %s523_s1, 256, %s33_s19, [#allocation6], %s381_s28, %s381_s28, %s382_s29  }
  0x14   :  { %s383_s7 = smov [#allocation2]   ;;  %s262_s11 = scalar_lea.hbm %s522_s0, 256 }
  0x15   :  { %s20_s8 = sshll.u32 %s383_s7, 4  ;;  %p263_p8 = scmp.ne.s32.totalorder %s522_s0, %s262_s11  ;;  %s21_s8 = int_to_ptr.vmem [resolvable:$true] %s20_s8 }
  0x16   :  { %p266_p9 = scmp.lt.u32.totalorder %s262_s11, %s522_s0 }
  0x18   :  { %p268_p10 = pnand %p266_p9, %p263_p8 }
  0x1a   :  { %271 = shalt.err (!%p268_p10)
}
  0x1b   :  { %s272_s16 = scalar_lea.vmem %s21_s8, 256  ;;  %p277_p12 = scmp.lt.s32.totalorder %s21_s8, %s21_s8 }
  0x1c   :  { %p273_p11 = scmp.ne.s32.totalorder %s21_s8, %s272_s16  ;;  %p278_p13 = scmp.lt.s32.totalorder %s272_s16, %s272_s16 }
  0x1e   :  { %p279_p0 = por %p278_p13, %p277_p12 }
  0x20   :  { %p280_p1 = pnand %p279_p0, %p273_p11 }
  0x22   :  { %283 = shalt.err (!%p280_p1)
}
  0x23   :  { %s384_s1 = smov 128   ;;  %s385_s17 = smov 8  }
  0x24   :  { %26 = dma.hbm_to_vmem [thread:$0]  %s522_s0, 256, %s21_s8, [#allocation3], %s384_s1, %s384_s1, %s385_s17  }
  0x25   :  { %s386_s20 = smov [#allocation7]   ;;  %s284_s24 = scalar_lea.hbm %s524_s2, 16 }
  0x26   :  { %s45_s21 = sshll.u32 %s386_s20, 4  ;;  %p285_p2 = scmp.ne.s32.totalorder %s524_s2, %s284_s24  ;;  %s46_s21 = int_to_ptr.vmem [resolvable:$true] %s45_s21 }
  0x27   :  { %p288_p3 = scmp.lt.u32.totalorder %s284_s24, %s524_s2 }
  0x29   :  { %p290_p4 = pnand %p288_p3, %p285_p2 }
  0x2b   :  { %293 = shalt.err (!%p290_p4)
}
  0x2c   :  { %s294_s6 = scalar_lea.vmem %s46_s21, 16  ;;  %s298_s0 = scalar_lea.vmem %s46_s21, 32 }
  0x2d   :  { %p295_p5 = scmp.ne.s32.totalorder %s46_s21, %s294_s6  ;;  %p299_p6 = scmp.lt.s32.totalorder %s46_s21, %s46_s21 }
  0x2e   :  { %p300_p7 = scmp.lt.s32.totalorder %s298_s0, %s294_s6 }
  0x30   :  { %p301_p8 = por %p300_p7, %p299_p6 }
  0x32   :  { %p302_p9 = pnand %p301_p8, %p295_p5 }
  0x34   :  { %305 = shalt.err (!%p302_p9)
}
  0x35   :  { %48 = dma.hbm_to_vmem [thread:$0]  %s524_s2, 16, %s46_s21, [#allocation6]  }
  0x36   :  { %372 = dma.done.wait [#allocation3], 256  }
  0x37   :  { %373 = vsyncadd [#allocation3], 4294967040 }
  0x38   :  { %374 = dma.done.wait [#allocation6], 272  }
  0x39   :  { %375 = vsyncadd [#allocation6], 4294967024  ;;  %v387_v0 = vmov 0.0   ;;  %vm388_vm0 = vmmov 0   ;;  %v238_v1 = vld [vmem:[#allocation5] sm:$0xff]   ;;  %v239_v2 = vld [vmem:[#allocation5 + $0x8] sm:$0xff]  }
  0x3a   :  { %217 = vmatprep.subr.bf16.mxu0 %v387_v0  ;;  %221 = vmatprep.mubr.msk.bf16.mxu0 %vm388_vm0, %v387_v0  ;;  %v59_v3 = vld [vmem:[#allocation2] sm:$0xff]  ;;  %v60_v4 = vld [vmem:[#allocation2 + $0x8] sm:$0xff]  ;;  %vm85_vm1 = vcmask 261120   ;;  %vm138_vm2 = vcmask 257024   ;;  %s389_s2 = smov [#allocation8]   ;;  %s390_s10 = smov 96  }
  0x3b   :  { %218 = vmatpush3.bf16.msra.mxu0 %v238_v1  ;;  %v61_v5 = vpack.c.bf16 %v60_v4, %v59_v3  ;;  %v206_v6 = vld [vmem:[#allocation7] ss:$0 sm:$0xff]  ;;  %s162_s9 = sshll.u32 %s389_s2, 4  ;;  %s163_s9 = int_to_ptr.vmem [resolvable:$true] %s162_s9 }
  0x3c   :  { %219 = vmatprep.subr.bf16.mxu0 %v387_v0  ;;  %s306_s11 = scalar_lea.vmem %s163_s9, 128  ;;  %p311_p11 = scmp.lt.s32.totalorder %s163_s9, %s163_s9 }
  0x3d   :  { %p307_p10 = scmp.ne.s32.totalorder %s163_s9, %s306_s11  ;;  %p312_p12 = scmp.lt.s32.totalorder %s306_s11, %s306_s11 }
  0x3f   :  { %220 = vmatpush3.bf16.msra.mxu0 %v239_v2  ;;  %p313_p13 = por %p312_p12, %p311_p11 }
  0x41   :  { %p314_p0 = pnand %p313_p13, %p307_p10 }
  0x42   :  { %222 = vmatmul.mubr.msk.bf16.vlgmr.msra.gmra.mrb[0].mxu0 %vm85_vm1, %v61_v5 }
 0x115   :  { %v123_v7 = vpop.f32.mrb[0].mxu0 }
 0x116   :  { %v124_v8 = vadd.f32 %v206_v6, %v123_v7  ;;  %v223_v9 = vpop.f32.mrb[1].mxu0 }
 0x117   :  { %v126_v10 = vpop.f32.mrb[2].mxu0 }
 0x118   :  { %v212_v11 = vpack.c.bf16 %v124_v8, %v124_v8  ;;  %v127_v12 = vadd.f32 %v206_v6, %v126_v10  ;;  %v224_v13 = vpop.f32.mrb[3].mxu0 }
 0x11a   :  { %v213_v14 = vpack.c.bf16 %v127_v12, %v127_v12  ;;  %149 = vrot.lane.b32.xlu1 %v212_v11, %s381_s28  ;;  %141 = vrot.lane.b32.xlu0 %v212_v11, %s390_s10  ;;  %139 = vst.msk [vmem:[#allocation8] sm:$0xf] %vm138_vm2, %v212_v11 }
 0x11c   :  { %140 = vst.msk [vmem:[#allocation8 + $0x4] sm:$0xf] %vm138_vm2, %v213_v14 }
 0x11d   :  { %317 = shalt.err (!%p314_p0)
}
 0x11e   :  { %s318_s14 = scalar_lea.hbm %s525_s3, 128 }
 0x11f   :  { %p319_p1 = scmp.ne.s32.totalorder %s525_s3, %s318_s14  ;;  %p322_p2 = scmp.lt.u32.totalorder %s318_s14, %s525_s3 }
 0x121   :  { %p324_p3 = pnand %p322_p2, %p319_p1 }
 0x123   :  { %327 = shalt.err (!%p324_p3)
}
 0x124   :  { %168 = dma.vmem_to_hbm [thread:$0]  %s163_s9, 128, %s525_s3, [#allocation4], %s381_s28, %s381_s28, %s382_s29  }
 0x125   :  { %151 = vrot.lane.b32.xlu1 %v213_v14, %s381_s28  ;;  %143 = vrot.lane.b32.xlu0 %v213_v14, %s390_s10  ;;  %s391_s20 = smov [#allocation9]   ;;  %s392_s22 = smov [#allocation11]  }
 0x126   :  { %s174_s21 = sshll.u32 %s391_s20, 4  ;;  %s186_s23 = sshll.u32 %s392_s22, 4  ;;  %s175_s21 = int_to_ptr.vmem [resolvable:$true] %s174_s21  ;;  %s483_s23 = int_to_ptr.vmem [resolvable:$true] %s186_s23 }
 0x127   :  { %s328_s3 = scalar_lea.vmem %s175_s21, 128  ;;  %p333_p5 = scmp.lt.s32.totalorder %s175_s21, %s175_s21 }
 0x128   :  { %p329_p4 = scmp.ne.s32.totalorder %s175_s21, %s328_s3  ;;  %p334_p6 = scmp.lt.s32.totalorder %s328_s3, %s328_s3 }
 0x12a   :  { %p335_p7 = por %p334_p6, %p333_p5 }
 0x12c   :  { %p336_p8 = pnand %p335_p7, %p329_p4 }
 0x18c   :  { %v150_v15 = vpop.permute.xlu1 %149  ;;  %v142_v16 = vpop.permute.xlu0 %141 }
 0x18d   :  { %155 = vst.msk [vmem:[#allocation11] sm:$0xf] %vm138_vm2, %v150_v15  ;;  %147 = vst.msk [vmem:[#allocation9] sm:$0xf] %vm138_vm2, %v142_v16 }
 0x197   :  { %v152_v17 = vpop.permute.xlu1 %151  ;;  %v144_v18 = vpop.permute.xlu0 %143 }
 0x198   :  { %156 = vst.msk [vmem:[#allocation11 + $0x4] sm:$0xf] %vm138_vm2, %v152_v17  ;;  %148 = vst.msk [vmem:[#allocation9 + $0x4] sm:$0xf] %vm138_vm2, %v144_v18 }
 0x199   :  { %339 = shalt.err (!%p336_p8)
}
 0x19a   :  { %s340_s26 = scalar_lea.hbm %s526_s4, 128 }
 0x19b   :  { %p341_p9 = scmp.ne.s32.totalorder %s526_s4, %s340_s26  ;;  %p344_p10 = scmp.lt.u32.totalorder %s340_s26, %s526_s4 }
 0x19d   :  { %p346_p11 = pnand %p344_p10, %p341_p9 }
 0x19f   :  { %349 = shalt.err (!%p346_p11)
}
 0x1a0   :  { %180 = dma.vmem_to_hbm [thread:$0]  %s175_s21, 128, %s526_s4, [#allocation10], %s381_s28, %s381_s28, %s382_s29  }
 0x1a1   :  { %s350_s2 = scalar_lea.vmem %s483_s23, 128  ;;  %p355_p13 = scmp.lt.s32.totalorder %s483_s23, %s483_s23 }
 0x1a2   :  { %p351_p12 = scmp.ne.s32.totalorder %s483_s23, %s350_s2  ;;  %p356_p0 = scmp.lt.s32.totalorder %s350_s2, %s350_s2 }
 0x1a4   :  { %p357_p1 = por %p356_p0, %p355_p13 }
 0x1a6   :  { %p358_p2 = pnand %p357_p1, %p351_p12 }
 0x1a8   :  { %361 = shalt.err (!%p358_p2)
}
 0x1a9   :  { %s362_s11 = scalar_lea.hbm %s527_s5, 128 }
 0x1aa   :  { %p363_p3 = scmp.ne.s32.totalorder %s527_s5, %s362_s11  ;;  %p366_p4 = scmp.lt.u32.totalorder %s362_s11, %s527_s5 }
 0x1ac   :  { %p368_p5 = pnand %p366_p4, %p363_p3 }
 0x1ae   :  { %371 = shalt.err (!%p368_p5)
}
 0x1af   :  { %192 = dma.vmem_to_hbm [thread:$0]  %s483_s23, 128, %s527_s5, [#allocation10], %s381_s28, %s381_s28, %s382_s29  }
 0x1b0   :  { %376 = dma.done.wait [#allocation4], 128  }
 0x1b1   :  { %377 = vsyncadd [#allocation4], 4294967168 }
 0x1b2   :  { %378 = dma.done.wait [#allocation10], 256  }
 0x1b3   :  { %379 = vsyncadd [#allocation10], 4294967040 }
 0x1b4   :  { %202 = vsyncpa [#allocation3], 1 }
 0x1b5   :  { %203 = vsyncpa [#allocation6], 1 }
 0x1b6   :  { %204 = vsyncpa [#allocation4], 1 }
 0x1b7   :  { %205 = vsyncpa [#allocation10], 1 }

</bundles_post_ra>
